<compile_context>
chip_gen: v6e
topology: v6e:2x2x1
jax: 0.10.0
libtpu: 0.0.40
codegen_flags: <defaults>
</compile_context>

<pallas_src>
import functools
import math

import jax
import jax.numpy as jnp
from jax import lax
from jax.experimental import pallas as pl
from jax.experimental.pallas import tpu as pltpu

# Explicit scoped-VMEM budget: fits under v7x's 64 MiB physical VMEM while
# leaving headroom; well above what any kernel below actually uses.
_VMEM_LIMIT = 48 * 1024 * 1024


# ----------------------------------------------------------------------------
# helpers
# ----------------------------------------------------------------------------
def _round_up(x, m):
    return ((x + m - 1) // m) * m


def _pick_tile(dim, max_tile, align):
    """Largest align-multiple tile <= max_tile that *divides* round_up(dim, align).

    Divisor-aware: for dim=768, align=128, max=256 this returns (256, 768)
    instead of padding to 1024.
    """
    padded = _round_up(dim, align)
    t = min(max_tile, padded)
    t = max(align, (t // align) * align)
    while padded % t != 0:
        t -= align
    return t, padded


def _pad2(a, rows, cols):
    r, c = a.shape
    if r == rows and c == cols:
        return a
    return jnp.pad(a, ((0, rows - r), (0, cols - c)))


def _erf_approx(x):
    # Abramowitz & Stegun 7.1.26 (|err| <= 1.5e-7).  Mosaic has no erf lowering,
    # so exact GELU's erf is evaluated in-kernel with exp + polynomial (EUP/VPU).
    p_ = 0.3275911
    a1, a2, a3, a4, a5 = (0.254829592, -0.284496736, 1.421413741,
                          -1.453152027, 1.061405429)
    sgn = jnp.where(x >= 0.0, 1.0, -1.0)
    ax = jnp.abs(x)
    t = 1.0 / (1.0 + p_ * ax)
    poly = ((((a5 * t + a4) * t + a3) * t + a2) * t + a1) * t
    return sgn * (1.0 - poly * jnp.exp(-ax * ax))


def _gelu_exact(x):
    # nn.GELU() (erf form); erf via high-accuracy polynomial (see above).
    return 0.5 * x * (1.0 + _erf_approx(x * 0.7071067811865476))


# ----------------------------------------------------------------------------
# Pallas kernels
# ----------------------------------------------------------------------------
def _linear_kernel(x_ref, w_ref, b_ref, o_ref):
    @pl.when(pl.program_id(2) == 0)
    def _():
        o_ref[...] = jnp.broadcast_to(b_ref[...], o_ref.shape)

    o_ref[...] += jnp.dot(x_ref[...], w_ref[...],
                          preferred_element_type=jnp.float32)


def _linear_res_kernel(x_ref, w_ref, b_ref, r_ref, o_ref):
    @pl.when(pl.program_id(2) == 0)
    def _():
        o_ref[...] = r_ref[...] + b_ref[...]

    o_ref[...] += jnp.dot(x_ref[...], w_ref[...],
                          preferred_element_type=jnp.float32)


def pallas_linear(x, w, b, residual=None, *, tm=256, tn=256, tk=256):
    """(M,K) @ (K,N) + b [+ residual] -> (M,N) f32.

    bf16 MXU operands, f32 accumulation directly into the resident output
    block (no scratch), optional residual fused into the k==0 prologue.
    """
    M, K = x.shape
    N = w.shape[1]
    tm, Mp = _pick_tile(M, tm, 16)
    tn, Np = _pick_tile(N, tn, 128)
    tk, Kp = _pick_tile(K, tk, 128)
    xp = _pad2(x, Mp, Kp).astype(jnp.bfloat16)
    wp = _pad2(w, Kp, Np).astype(jnp.bfloat16)          # weights pre-cast at init
    bp = jnp.pad(b.astype(jnp.float32), ((0, Np - N),)).reshape(1, Np)
    grid = (Mp // tm, Np // tn, Kp // tk)

    in_specs = [
        pl.BlockSpec((tm, tk), lambda i, j, k: (i, k)),
        pl.BlockSpec((tk, tn), lambda i, j, k: (k, j)),
        pl.BlockSpec((1, tn), lambda i, j, k: (0, j)),
    ]
    args = [xp, wp, bp]
    kernel = _linear_kernel
    if residual is not None:
        in_specs.append(pl.BlockSpec((tm, tn), lambda i, j, k: (i, j)))
        args.append(_pad2(residual.astype(jnp.float32), Mp, Np))
        kernel = _linear_res_kernel

    out = pl.pallas_call(
        kernel,
        out_shape=jax.ShapeDtypeStruct((Mp, Np), jnp.float32),
        grid=grid,
        in_specs=in_specs,
        out_specs=pl.BlockSpec((tm, tn), lambda i, j, k: (i, j)),
        compiler_params=pltpu.CompilerParams(
            dimension_semantics=("parallel", "parallel", "arbitrary"),
            vmem_limit_bytes=_VMEM_LIMIT),
    )(*args)
    return out[:M, :N]


def _ln_linear_kernel(x_ref, g_ref, bt_ref, w_ref, b_ref, o_ref, y_ref,
                      *, eps, gelu):
    # LayerNorm computed once per row tile (j == 0), cached as bf16 in VMEM and
    # reused for every N-tile of the following matmul.
    @pl.when(pl.program_id(1) == 0)
    def _():
        x = x_ref[...].astype(jnp.float32)
        mean = jnp.mean(x, axis=-1, keepdims=True)
        var = jnp.mean((x - mean) * (x - mean), axis=-1, keepdims=True)
        y = (x - mean) * lax.rsqrt(var + eps) * g_ref[...] + bt_ref[...]
        y_ref[...] = y.astype(y_ref.dtype)

    z = (jnp.dot(y_ref[...], w_ref[...], preferred_element_type=jnp.float32)
         + b_ref[...])
    if gelu:
        z = _gelu_exact(z)
    o_ref[...] = z.astype(o_ref.dtype)


def pallas_ln_linear(x, g, beta, w, b, *, eps=1e-5, gelu=False,
                     out_dtype=jnp.float32, tm=256, tn=256):
    """Fused LayerNorm (over full K, exact f32 stats) -> Linear [-> GELU]."""
    M, K = x.shape
    N = w.shape[1]
    tm, Mp = _pick_tile(M, tm, 16)
    tn, Np = _pick_tile(N, tn, 128)
    xp = _pad2(x, Mp, K)
    wp = _pad2(w, K, Np).astype(jnp.bfloat16)
    bp = jnp.pad(b.astype(jnp.float32), ((0, Np - N),)).reshape(1, Np)
    grid = (Mp // tm, Np // tn)
    out = pl.pallas_call(
        functools.partial(_ln_linear_kernel, eps=eps, gelu=gelu),
        out_shape=jax.ShapeDtypeStruct((Mp, Np), out_dtype),
        grid=grid,
        in_specs=[
            pl.BlockSpec((tm, K), lambda i, j: (i, 0)),
            pl.BlockSpec((1, K), lambda i, j: (0, 0)),
            pl.BlockSpec((1, K), lambda i, j: (0, 0)),
            pl.BlockSpec((K, tn), lambda i, j: (0, j)),
            pl.BlockSpec((1, tn), lambda i, j: (0, j)),
        ],
        out_specs=pl.BlockSpec((tm, tn), lambda i, j: (i, j)),
        scratch_shapes=[pltpu.VMEM((tm, K), jnp.bfloat16)],
        compiler_params=pltpu.CompilerParams(
            dimension_semantics=("parallel", "arbitrary"),
            vmem_limit_bytes=_VMEM_LIMIT),
    )(xp, g.reshape(1, K), beta.reshape(1, K), wp, bp)
    return out[:M, :N]


def _layernorm_kernel(x_ref, g_ref, b_ref, o_ref, *, eps):
    x = x_ref[...].astype(jnp.float32)
    mean = jnp.mean(x, axis=-1, keepdims=True)
    var = jnp.mean((x - mean) * (x - mean), axis=-1, keepdims=True)
    y = (x - mean) * lax.rsqrt(var + eps)
    o_ref[...] = (y * g_ref[...] + b_ref[...]).astype(o_ref.dtype)


def pallas_layernorm(x, g, b, eps=1e-5, tm=512):
    """x: (M, D) -> (M, D), torch.nn.LayerNorm semantics (biased var)."""
    M, D = x.shape
    tm, Mp = _pick_tile(M, tm, 8)
    xp = _pad2(x, Mp, D)
    out = pl.pallas_call(
        functools.partial(_layernorm_kernel, eps=eps),
        out_shape=jax.ShapeDtypeStruct((Mp, D), jnp.float32),
        grid=(Mp // tm,),
        in_specs=[
            pl.BlockSpec((tm, D), lambda i: (i, 0)),
            pl.BlockSpec((1, D), lambda i: (0, 0)),
            pl.BlockSpec((1, D), lambda i: (0, 0)),
        ],
        out_specs=pl.BlockSpec((tm, D), lambda i: (i, 0)),
        compiler_params=pltpu.CompilerParams(dimension_semantics=("parallel",)),
    )(xp, g.reshape(1, D), b.reshape(1, D))
    return out[:M]


def _attn_kernel(q_ref, k_ref, v_ref, o_ref, *, scale):
    q = q_ref[0]                                            # (S, Dh) bf16
    k = k_ref[0]
    v = v_ref[0]
    s = lax.dot_general(q, k, (((1,), (1,)), ((), ())),
                        preferred_element_type=jnp.float32) * scale
    s = s - jnp.max(s, axis=-1, keepdims=True)
    p = jnp.exp(s)
    p = p * pl.reciprocal(jnp.sum(p, axis=-1, keepdims=True), approx=True)
    o_ref[0] = jnp.dot(p.astype(v.dtype), v,
                       preferred_element_type=jnp.float32).astype(o_ref.dtype)


def pallas_attention(q, k, v, scale):
    """q,k,v: (B*heads, S, Dh) bf16 -> (B*heads, S, Dh) bf16.

    One (batch, head) per grid step: bf16 MXU matmuls with f32 accumulation,
    lane-dense (full Dh) blocks, per-step VMEM O(S*Dh + S*S) for a single head.
    # TODO(synk): add KV-block online-softmax (flash) tiling for very long S.
    """
    BH, S, Dh = q.shape
    return pl.pallas_call(
        functools.partial(_attn_kernel, scale=scale),
        out_shape=jax.ShapeDtypeStruct((BH, S, Dh), jnp.bfloat16),
        grid=(BH,),
        in_specs=[pl.BlockSpec((1, S, Dh), lambda i: (i, 0, 0))] * 3,
        out_specs=pl.BlockSpec((1, S, Dh), lambda i: (i, 0, 0)),
        compiler_params=pltpu.CompilerParams(
            dimension_semantics=("parallel",),
            vmem_limit_bytes=_VMEM_LIMIT),
    )(q, k, v)


def _hog_norm_kernel(x1_ref, x2_ref, y1_ref, y2_ref, o_ref):
    gx = jnp.log(x1_ref[...] / x2_ref[...])
    gy = jnp.log(y1_ref[...] / y2_ref[...])
    o_ref[...] = jnp.sqrt(gx * gx + gy * gy)


def pallas_hog_norm(gx1, gx2, gy1, gy2):
    """Elementwise sqrt(log(gx1/gx2)^2 + log(gy1/gy2)^2), lane-dense tiles."""
    shape = gx1.shape
    T = gx1.size
    rows = pl.cdiv(T, 128)
    tr, R = _pick_tile(rows, 512, 8)
    Tp = R * 128

    def prep(a):
        return jnp.pad(a.reshape(-1), (0, Tp - T),
                       constant_values=1.0).reshape(R, 128)

    out = pl.pallas_call(
        _hog_norm_kernel,
        out_shape=jax.ShapeDtypeStruct((R, 128), jnp.float32),
        grid=(R // tr,),
        in_specs=[pl.BlockSpec((tr, 128), lambda i: (i, 0))] * 4,
        out_specs=pl.BlockSpec((tr, 128), lambda i: (i, 0)),
        compiler_params=pltpu.CompilerParams(dimension_semantics=("parallel",)),
    )(prep(gx1), prep(gx2), prep(gy1), prep(gy2))
    return out.reshape(-1)[:T].reshape(shape)


def _masked_mse_kernel(p_ref, t_ref, m_ref, o_ref):
    @pl.when(pl.program_id(0) == 0)
    def _():
        o_ref[...] = jnp.zeros_like(o_ref)

    d = p_ref[...] - t_ref[...]
    per_row = jnp.mean(d * d, axis=-1, keepdims=True)          # (tm, 1)
    # mask block is (tm, 1): negligible traffic next to the (tm, Dt) operands.
    o_ref[...] += jnp.sum(per_row * m_ref[...])


def pallas_masked_mse_sum(pred2d, tgt2d, mask2d, *, tm=256):
    """sum over rows of mask * mean((pred - tgt)^2, axis=-1)  -> scalar."""
    M, Dt = pred2d.shape
    tm, Mp = _pick_tile(M, tm, 8)
    pp = _pad2(pred2d, Mp, Dt)
    tp = _pad2(tgt2d, Mp, Dt)
    mp = _pad2(mask2d, Mp, 1)
    out = pl.pallas_call(
        _masked_mse_kernel,
        out_shape=jax.ShapeDtypeStruct((1, 1), jnp.float32),
        grid=(Mp // tm,),
        in_specs=[
            pl.BlockSpec((tm, Dt), lambda i: (i, 0)),
            pl.BlockSpec((tm, Dt), lambda i: (i, 0)),
            pl.BlockSpec((tm, 1), lambda i: (i, 0)),
        ],
        out_specs=pl.BlockSpec((1, 1), lambda i: (0, 0)),
        compiler_params=pltpu.CompilerParams(dimension_semantics=("arbitrary",)),
    )(pp, tp, mp)
    return out[0, 0]


# ----------------------------------------------------------------------------
# Model glue (plain JAX)
# ----------------------------------------------------------------------------
def conv_patchify(imgs, p):
    # feature order (C, ph, pw) matches Conv2d weight flatten order
    N, C, H, W = imgs.shape
    h, w = H // p, W // p
    x = imgs.reshape(N, C, h, p, w, p)
    x = jnp.einsum('nchpwq->nhwcpq', x)
    return x.reshape(N, h * w, C * p * p)


def patchify(imgs, p):
    # matches MaskedAutoencoderViT.patchify (feature order ph, pw, C)
    N, C, H, W = imgs.shape
    h, w = H // p, W // p
    x = imgs.reshape(N, C, h, p, w, p)
    x = jnp.einsum('nchpwq->nhwpqc', x)
    return x.reshape(N, h * w, p * p * C)


def _sincos_1d(dim, pos):
    omega = jnp.arange(dim // 2, dtype=jnp.float32) / (dim / 2.0)
    omega = 1.0 / (10000.0 ** omega)
    out = pos.reshape(-1)[:, None] * omega[None, :]
    return jnp.concatenate([jnp.sin(out), jnp.cos(out)], axis=1)


def get_2d_sincos_pos_embed(dim, grid_size, cls_token=True):
    gw = jnp.arange(grid_size, dtype=jnp.float32)
    gh = jnp.arange(grid_size, dtype=jnp.float32)
    grid_w, grid_h = jnp.meshgrid(gw, gh)
    emb_h = _sincos_1d(dim // 2, grid_h)
    emb_w = _sincos_1d(dim // 2, grid_w)
    emb = jnp.concatenate([emb_h, emb_w], axis=1)
    if cls_token:
        emb = jnp.concatenate([jnp.zeros((1, dim), jnp.float32), emb], axis=0)
    return emb


def sar_hog(imgs, k):
    """SAR_HOGLayerC.forward via separable box sums (integral images)."""
    N, C, H, W = imgs.shape
    K = 2 * k + 1
    xp = jnp.pad(imgs, ((0, 0), (0, 0), (k, k), (k, k)), mode='reflect') + 0.01
    xp = xp[:, 0]                                          # (N, H+2k, W+2k)
    Hp, Wp = H + 2 * k, W + 2 * k

    # vertical K-row window sums over every padded column
    csv = jnp.concatenate(
        [jnp.zeros((N, 1, Wp), xp.dtype), jnp.cumsum(xp, axis=1)], axis=1)
    V = csv[:, K:K + H, :] - csv[:, :H, :]                 # (N, H, Wp)
    csw = jnp.concatenate(
        [jnp.zeros((N, H, 1), xp.dtype), jnp.cumsum(V, axis=2)], axis=2)
    gx1 = csw[:, :, k + 1:k + 1 + W] - csw[:, :, :W]       # M11: left  cols
    gx2 = csw[:, :, K:K + W] - csw[:, :, k:k + W]          # M21: right cols

    # horizontal K-col window sums over every padded row
    csh = jnp.concatenate(
        [jnp.zeros((N, Hp, 1), xp.dtype), jnp.cumsum(xp, axis=2)], axis=2)
    Hsum = csh[:, :, K:K + W] - csh[:, :, :W]              # (N, Hp, W)
    csh2 = jnp.concatenate(
        [jnp.zeros((N, 1, W), Hsum.dtype), jnp.cumsum(Hsum, axis=1)], axis=1)
    gy1 = csh2[:, k + 1:k + 1 + H, :] - csh2[:, :H, :]     # M13: top    rows
    gy2 = csh2[:, K:K + H, :] - csh2[:, k:k + H, :]        # M23: bottom rows

    norm = pallas_hog_norm(gx1, gx2, gy1, gy2)             # (N, H, W)
    return norm.reshape(N, 1, H, W)


def vit_block(x, prm, heads):
    B, S, D = x.shape
    Dh = D // heads
    scale = Dh ** -0.5
    xf = x.reshape(B * S, D)

    # LN1 fused into qkv projection; bf16 activation straight into attention.
    qkv = pallas_ln_linear(xf, prm['n1_g'], prm['n1_b'],
                           prm['qkv_w'], prm['qkv_b'],
                           out_dtype=jnp.bfloat16)               # (B*S, 3D) bf16
    qkv = qkv.reshape(B, S, 3, heads, Dh)
    qkv = jnp.transpose(qkv, (2, 0, 3, 1, 4)).reshape(3, B * heads, S, Dh)
    o = pallas_attention(qkv[0], qkv[1], qkv[2], scale)          # (B*H, S, Dh) bf16
    o = jnp.transpose(o.reshape(B, heads, S, Dh),
                      (0, 2, 1, 3)).reshape(B * S, D)
    # attn projection with the residual add fused into the matmul prologue
    xf = pallas_linear(o, prm['proj_w'], prm['proj_b'], residual=xf)

    # LN2 fused into fc1 with exact-GELU epilogue; bf16 hidden activation.
    h = pallas_ln_linear(xf, prm['n2_g'], prm['n2_b'],
                         prm['fc1_w'], prm['fc1_b'],
                         gelu=True, out_dtype=jnp.bfloat16)
    xf = pallas_linear(h, prm['fc2_w'], prm['fc2_b'], residual=xf)
    return xf.reshape(B, S, D)


def masking_id(key, N, L, mask_ratio):
    # TODO(synk): argsort/gather random masking left to XLA glue (no clean Pallas equivalent).
    len_keep = int(L * (1 - mask_ratio))
    noise = jax.random.uniform(key, (N, L))
    ids_shuffle = jnp.argsort(noise, axis=1)
    ids_restore = jnp.argsort(ids_shuffle, axis=1)
    ids_keep = ids_shuffle[:, :len_keep]
    mask = jnp.ones((N, L), jnp.float32)
    mask = mask.at[:, :len_keep].set(0.0)
    mask = jnp.take_along_axis(mask, ids_restore, axis=1)
    return ids_keep, ids_restore, mask


def forward_encoder(params, cfg, imgs, mask_ratio, mask_key):
    N = imgs.shape[0]
    p = cfg['patch_size']
    L = cfg['num_patches']
    D = cfg['embed_dim']
    ids_keep, ids_restore, mask = masking_id(mask_key, N, L, mask_ratio)
    # patch_embed(x, mask): plain PatchEmbed stem ignores the mask argument.
    # TODO(synk): mask-consuming custom stems (ConvPatchEmbed variants) not modeled.
    # Channel-triplication fold: forward feeds [imgs, imgs, imgs]; summing the
    # patch-embed weight rows over the channel axis is an exact identity, so we
    # patchify the single-channel image against the pre-folded weight.
    tok = conv_patchify(imgs, p)                              # (N, L, p*p)
    x = pallas_linear(tok.reshape(N * L, -1), params['pe_w'], params['pe_b'])
    x = pallas_layernorm(x, params['pe_n_g'], params['pe_n_b']).reshape(N, L, D)
    x = x + params['pos_embed'][:, 1:, :]
    len_keep = ids_keep.shape[1]
    x = jnp.take_along_axis(
        x, jnp.broadcast_to(ids_keep[:, :, None], (N, len_keep, D)), axis=1)
    cls = params['cls_token'] + params['pos_embed'][:, :1, :]
    cls = jnp.broadcast_to(cls, (N, 1, D))
    x = jnp.concatenate([cls, x], axis=1)
    for blk in params['blocks']:
        x = vit_block(x, blk, cfg['num_heads'])
    S = x.shape[1]
    x = pallas_layernorm(x.reshape(N * S, D),
                         params['norm_g'], params['norm_b']).reshape(N, S, D)
    return x, mask, ids_restore


def forward_decoder(params, cfg, x, ids_restore):
    N, S, _ = x.shape
    Dd = cfg['decoder_embed_dim']
    L = cfg['num_patches']
    x = pallas_linear(x.reshape(N * S, -1),
                      params['dec_embed_w'],
                      params['dec_embed_b']).reshape(N, S, Dd)
    n_mask = L + 1 - S
    mask_tokens = jnp.broadcast_to(params['mask_token'], (N, n_mask, Dd))
    x_ = jnp.concatenate([x[:, 1:, :], mask_tokens], axis=1)        # (N, L, Dd)
    idx = jnp.broadcast_to(ids_restore[:, :, None], (N, L, Dd))
    x_ = jnp.take_along_axis(x_, idx, axis=1)
    x = jnp.concatenate([x[:, :1, :], x_], axis=1)                  # (N, L+1, Dd)
    x = x + params['dec_pos_embed']
    for blk in params['dec_blocks']:
        x = vit_block(x, blk, cfg['decoder_num_heads'])
    Sd = x.shape[1]
    # decoder_norm fused into decoder_pred
    xf = pallas_ln_linear(x.reshape(N * Sd, Dd),
                          params['dec_norm_g'], params['dec_norm_b'],
                          params['dec_pred_w'],
                          params['dec_pred_b']).reshape(N, Sd, -1)
    cls_pred, pred = xf[:, :1, :], xf[:, 1:, :]
    return cls_pred, pred


def forward_loss(params, cfg, imgs, cls_pred, pred, mask):
    p = cfg['patch_size']
    # HOG output is single-channel; patchify with its actual channel count.
    tgt = jnp.concatenate(
        [patchify(sar_hog(imgs, k), p) for k in (5, 9, 13, 17)], axis=-1)
    if cfg.get('norm_pix_loss', False):
        mean = tgt.mean(axis=-1, keepdims=True)
        var = tgt.var(axis=-1, keepdims=True)
        tgt = (tgt - mean) / jnp.sqrt(var + 1e-6)
    N, L, Dt = pred.shape
    loss_sum = pallas_masked_mse_sum(
        pred.reshape(N * L, Dt), tgt.reshape(N * L, Dt),
        mask.reshape(N * L, 1).astype(jnp.float32))
    return loss_sum / mask.sum()


def forward(params, cfg, imgs, mask_ratio=0.75, mask_key=None):
    # torch does forward_encoder(cat([imgs]*3)); the triplication is folded into
    # the patch-embed weight at init (exact identity), so we pass imgs directly.
    latent, mask, ids_restore = forward_encoder(params, cfg, imgs, mask_ratio, mask_key)
    cls_pred, pred = forward_decoder(params, cfg, latent, ids_restore)
    loss = forward_loss(params, cfg, imgs, cls_pred, pred, mask)
    return loss, pred, mask


# ----------------------------------------------------------------------------
# Deterministic parameter init (synthetic; no checkpoint loading)
# Weights are pre-cast to bf16 once here (no per-call cast/copy at runtime).
# ----------------------------------------------------------------------------
def glorot(key, shape):
    limit = math.sqrt(6.0 / (shape[0] + shape[1]))
    return jax.random.uniform(key, shape, jnp.float32, -limit, limit)


def _bf16(x):
    return x.astype(jnp.bfloat16)


def init_block_params(key, dim, mlp_ratio):
    hidden = int(dim * mlp_ratio)
    ks = jax.random.split(key, 4)
    return dict(
        n1_g=jnp.ones((dim,), jnp.float32), n1_b=jnp.zeros((dim,), jnp.float32),
        qkv_w=_bf16(glorot(ks[0], (dim, 3 * dim))),
        qkv_b=jnp.zeros((3 * dim,), jnp.float32),
        proj_w=_bf16(glorot(ks[1], (dim, dim))),
        proj_b=jnp.zeros((dim,), jnp.float32),
        n2_g=jnp.ones((dim,), jnp.float32), n2_b=jnp.zeros((dim,), jnp.float32),
        fc1_w=_bf16(glorot(ks[2], (dim, hidden))),
        fc1_b=jnp.zeros((hidden,), jnp.float32),
        fc2_w=_bf16(glorot(ks[3], (hidden, dim))),
        fc2_b=jnp.zeros((dim,), jnp.float32),
    )


def init_params(key, cfg):
    p = cfg['patch_size']
    D, Dd = cfg['embed_dim'], cfg['decoder_embed_dim']
    L = cfg['num_patches']
    gs = int(round(L ** 0.5))
    keys = iter(jax.random.split(key, 8 + cfg['depth'] + cfg['decoder_depth']))
    pp = p * p
    pe_w_full = glorot(next(keys), (3 * pp, D))
    # exact channel-triplication fold (encoder input is always [imgs, imgs, imgs])
    pe_w = _bf16(pe_w_full[:pp] + pe_w_full[pp:2 * pp] + pe_w_full[2 * pp:])
    return dict(
        pe_w=pe_w, pe_b=jnp.zeros((D,), jnp.float32),
        pe_n_g=jnp.ones((D,), jnp.float32), pe_n_b=jnp.zeros((D,), jnp.float32),
        cls_token=0.02 * jax.random.normal(next(keys), (1, 1, D), jnp.float32),
        pos_embed=get_2d_sincos_pos_embed(D, gs)[None],
        blocks=[init_block_params(next(keys), D, cfg['mlp_ratio'])
                for _ in range(cfg['depth'])],
        norm_g=jnp.ones((D,), jnp.float32), norm_b=jnp.zeros((D,), jnp.float32),
        dec_embed_w=_bf16(glorot(next(keys), (D, Dd))),
        dec_embed_b=jnp.zeros((Dd,), jnp.float32),
        mask_token=0.02 * jax.random.normal(next(keys), (1, 1, Dd), jnp.float32),
        dec_pos_embed=get_2d_sincos_pos_embed(Dd, gs)[None],
        dec_blocks=[init_block_params(next(keys), Dd, cfg['mlp_ratio'])
                    for _ in range(cfg['decoder_depth'])],
        dec_norm_g=jnp.ones((Dd,), jnp.float32),
        dec_norm_b=jnp.zeros((Dd,), jnp.float32),
        dec_pred_w=_bf16(glorot(next(keys), (Dd, 256 * 4))),
        dec_pred_b=jnp.zeros((256 * 4,), jnp.float32),
    )


# ----------------------------------------------------------------------------
if __name__ == "__main__":
    cfg = dict(
        img_size=32, patch_size=16, in_chans=1,
        embed_dim=64, depth=2, num_heads=4,
        decoder_embed_dim=32, decoder_depth=1, decoder_num_heads=4,
        mlp_ratio=4.0, norm_pix_loss=False,
    )
    cfg['num_patches'] = (cfg['img_size'] // cfg['patch_size']) ** 2

    root = jax.random.PRNGKey(0)
    k_img, k_param, k_mask = jax.random.split(root, 3)
    # single-channel (SAR) input; the encoder's channel triplication is folded
    # into the patch-embed weight at init.
    imgs = jax.random.uniform(
        k_img, (2, 1, cfg['img_size'], cfg['img_size']), dtype=jnp.float32)
    params = init_params(k_param, cfg)

    loss, pred, mask = forward(params, cfg, imgs, mask_ratio=0.75, mask_key=k_mask)
    jax.block_until_ready((loss, pred, mask))
    assert pred.shape == (2, cfg['num_patches'], 256 * 4)
    assert mask.shape == (2, cfg['num_patches'])
    assert bool(jnp.isfinite(loss))
    print("KERNEL_OK")
</pallas_src>

<mosaic_0001>
module attributes {stable_mosaic.version = 11 : i64} {
  func.func @_linear_kernel(%arg0: i32, %arg1: i32, %arg2: i32, %arg3: memref<16x256xbf16, #tpu.memory_space<vmem>>, %arg4: memref<256x128xbf16, #tpu.memory_space<vmem>>, %arg5: memref<1x128xf32, #tpu.memory_space<vmem>>, %arg6: memref<16x128xf32, #tpu.memory_space<vmem>>) attributes {dimension_semantics = [#tpu.dimension_semantics<parallel>, #tpu.dimension_semantics<parallel>, #tpu.dimension_semantics<arbitrary>], iteration_bounds = array<i64: 1, 1, 1>, scalar_prefetch = 0 : i64, scratch_operands = 0 : i64, tpu.core_type = #tpu.core_type<tc>, window_params = [{transform_indices = @transform_0, window_bounds = array<i64: 16, 256>}, {transform_indices = @transform_1, window_bounds = array<i64: 256, 128>}, {transform_indices = @transform_2, window_bounds = array<i64: 1, 128>}, {transform_indices = @transform_3, window_bounds = array<i64: 16, 128>}]} {
    %c0_i32 = arith.constant 0 : i32
    %0 = arith.cmpi eq, %arg2, %c0_i32 : i32
    %1 = arith.extui %0 : i1 to i32
    %c0_i32_0 = arith.constant 0 : i32
    %2 = arith.cmpi ne, %1, %c0_i32_0 : i32
    scf.if %2 {
      %c0_8 = arith.constant 0 : index
      %c0_9 = arith.constant 0 : index
      %9 = vector.load %arg5[%c0_8, %c0_9] : memref<1x128xf32, #tpu.memory_space<vmem>>, vector<1x128xf32>
      %10 = vector.shape_cast %9 : vector<1x128xf32> to vector<1x128xf32>
      %11 = vector.broadcast %10 : vector<1x128xf32> to vector<16x128xf32>
      %c0_10 = arith.constant 0 : index
      %c0_11 = arith.constant 0 : index
      %12 = vector.load %arg6[%c0_10, %c0_11] : memref<16x128xf32, #tpu.memory_space<vmem>>, vector<16x128xf32>
      tpu.vector_store %arg6[%c0_10, %c0_11], %11 {strides = array<i32>} : memref<16x128xf32, #tpu.memory_space<vmem>>, vector<16x128xf32>,
    } else {
    }
    %c0 = arith.constant 0 : index
    %c0_1 = arith.constant 0 : index
    %3 = vector.load %arg6[%c0, %c0_1] : memref<16x128xf32, #tpu.memory_space<vmem>>, vector<16x128xf32>
    %c0_2 = arith.constant 0 : index
    %c0_3 = arith.constant 0 : index
    %4 = vector.load %arg3[%c0_2, %c0_3] : memref<16x256xbf16, #tpu.memory_space<vmem>>, vector<16x256xbf16>
    %c0_4 = arith.constant 0 : index
    %c0_5 = arith.constant 0 : index
    %5 = vector.load %arg4[%c0_4, %c0_5] : memref<256x128xbf16, #tpu.memory_space<vmem>>, vector<256x128xbf16>
    %cst = arith.constant dense<0.000000e+00> : vector<16x128xf32>
    %6 = tpu.matmul %4, %5, %cst {dimension_numbers = #tpu.dot_dimension_numbers<[1], [0], [0], [1], [0, 0, 1, 1], [], []>} : vector<16x256xbf16>, vector<256x128xbf16>, vector<16x128xf32> -> vector<16x128xf32>
    %7 = arith.addf %3, %6 : vector<16x128xf32>
    %c0_6 = arith.constant 0 : index
    %c0_7 = arith.constant 0 : index
    %8 = vector.load %arg6[%c0_6, %c0_7] : memref<16x128xf32, #tpu.memory_space<vmem>>, vector<16x128xf32>
    tpu.vector_store %arg6[%c0_6, %c0_7], %7 {strides = array<i32>} : memref<16x128xf32, #tpu.memory_space<vmem>>, vector<16x128xf32>,
    return
  }
  func.func @transform_0(%arg0: i32, %arg1: i32, %arg2: i32) -> (i32, i32) {
    %c0_i32 = arith.constant 0 : i32
    return %arg0, %arg2 : i32, i32
  }
  func.func @transform_1(%arg0: i32, %arg1: i32, %arg2: i32) -> (i32, i32) {
    %c0_i32 = arith.constant 0 : i32
    return %arg2, %arg1 : i32, i32
  }
  func.func @transform_2(%arg0: i32, %arg1: i32, %arg2: i32) -> (i32, i32) {
    %c0_i32 = arith.constant 0 : i32
    %c0_i32_0 = arith.constant 0 : i32
    return %c0_i32, %arg1 : i32, i32
  }
  func.func @transform_3(%arg0: i32, %arg1: i32, %arg2: i32) -> (i32, i32) {
    %c0_i32 = arith.constant 0 : i32
    return %arg0, %arg1 : i32, i32
  }
}

</mosaic_0001>

<bundles_post_ra>
// kernel: tpu_custom_call.1
= control target key start
LH: loop header
LB: loop body
LE: loop exit
PB: predicated region body
PF: predicated region fallthrough
CT: control target
= control target key end

     0   :  { %8 = vsyncpa [#allocation3], 0  ;;  %s440_s0 = inlined_call_operand.hbm [shape: bf16[16,256], index: 0, kind: input, shape index: {}]   ;;  %s441_s1 = inlined_call_operand.hbm [shape: bf16[256,128], index: 1, kind: input, shape index: {}]   ;;  %s442_s2 = inlined_call_operand.vmem [shape: f32[1,128], index: 2, kind: input, shape index: {}]   ;;  %s443_s3 = inlined_call_operand.hbm [shape: f32[16,128], index: 3, kind: output, shape index: {}]  }
   0x1   :  { %9 = vsyncpa [#allocation6], 0 }
   0x2   :  { %10 = vsyncpa [#allocation4], 0  ;;  %s395_s12 = smov [#allocation2]  }
   0x3   :  { %s16_s13 = sshll.u32 %s395_s12, 4  ;;  %s17_s13 = int_to_ptr.vmem [resolvable:$true] %s16_s13 }
   0x4   :  { %s337_s14 = scalar_lea.vmem %s17_s13, 256  ;;  %p342_p1 = scmp.lt.s32.totalorder %s17_s13, %s17_s13 }
   0x5   :  { %p338_p0 = scmp.ne.s32.totalorder %s17_s13, %s337_s14  ;;  %p343_p2 = scmp.lt.s32.totalorder %s337_s14, %s337_s14 }
   0x7   :  { %p344_p3 = por %p343_p2, %p342_p1 }
   0x9   :  { %p345_p4 = pnand %p344_p3, %p338_p0 }
   0xb   :  { %348 = shalt.err (!%p345_p4)
}
   0xc   :  { %s396_s15 = smov 128   ;;  %s397_s16 = smov 8  }
   0xd   :  { %22 = dma.hbm_to_vmem [thread:$0]  %s440_s0, 256, %s17_s13, [#allocation3], %s396_s15, %s396_s15, %s397_s16  }
   0xe   :  { %s398_s19 = smov [#allocation5]  }
   0xf   :  { %s28_s20 = sshll.u32 %s398_s19, 4  ;;  %s29_s20 = int_to_ptr.vmem [resolvable:$true] %s28_s20 }
  0x10   :  { %s357_s21 = scalar_lea.vmem %s29_s20, 2048  ;;  %p362_p6 = scmp.lt.s32.totalorder %s29_s20, %s29_s20 }
  0x11   :  { %p358_p5 = scmp.ne.s32.totalorder %s29_s20, %s357_s21  ;;  %p363_p7 = scmp.lt.s32.totalorder %s357_s21, %s357_s21 }
  0x13   :  { %p364_p8 = por %p363_p7, %p362_p6 }
  0x15   :  { %p365_p9 = pnand %p364_p8, %p358_p5 }
  0x17   :  { %368 = shalt.err (!%p365_p9)
}
  0x18   :  { %s399_s22 = smov 64   ;;  %s400_s23 = smov 4  }
  0x19   :  { %34 = dma.hbm_to_vmem [thread:$0]  %s441_s1, 2048, %s29_s20, [#allocation6], %s399_s22, %s399_s22, %s400_s23  }
  0x1a   :  { %389 = dma.done.wait [#allocation3], 256  }
  0x1b   :  { %390 = vsyncadd [#allocation3], 4294967040 }
  0x1c   :  { %391 = dma.done.wait [#allocation6], 2048  }
  0x1d   :  { %392 = vsyncadd [#allocation6], 4294965248  ;;  %v310_v0 = vld [vmem:[#allocation5 + $0x78] sm:$0xff]   ;;  %v312_v2 = vld [vmem:[#allocation5 + $0x70] sm:$0xff]   ;;  %s401_s26 = smov [#allocation7]  }
  0x1e   :  { %v311_v1 = vld [vmem:[#allocation5 + $0x38] sm:$0xff]   ;;  %281 = vmatprep.subr.bf16.mxu0 %v310_v0  ;;  %v313_v3 = vld [vmem:[#allocation5 + $0x30] sm:$0xff]   ;;  %v314_v4 = vld [vmem:[#allocation5 + $0x68] sm:$0xff]   ;;  %s249_s27 = sshll.u32 %s401_s26, 4  ;;  %s250_s27 = int_to_ptr.vmem [resolvable:$true] %s249_s27 }
  0x1f   :  { %282 = vmatpush3.bf16.msra.mxu0 %v311_v1  ;;  %v315_v5 = vld [vmem:[#allocation5 + $0x28] sm:$0xff]   ;;  %v316_v6 = vld [vmem:[#allocation5 + $0x60] sm:$0xff]   ;;  %v318_v8 = vld [vmem:[#allocation5 + $0x58] sm:$0xff]   ;;  %s369_s28 = scalar_lea.vmem %s250_s27, 256  ;;  %p374_p11 = scmp.lt.s32.totalorder %s250_s27, %s250_s27 }
  0x20   :  { %283 = vmatprep.subr.bf16.mxu0 %v312_v2  ;;  %v317_v7 = vld [vmem:[#allocation5 + $0x20] sm:$0xff]   ;;  %v319_v9 = vld [vmem:[#allocation5 + $0x18] sm:$0xff]   ;;  %v320_v10 = vld [vmem:[#allocation5 + $0x50] sm:$0xff]   ;;  %p370_p10 = scmp.ne.s32.totalorder %s250_s27, %s369_s28  ;;  %p375_p12 = scmp.lt.s32.totalorder %s369_s28, %s369_s28 }
  0x21   :  { %v328_v11 = vld [vmem:[#allocation2 + $0x4] ss:$8 sps:$4 sm:$0xff]   ;;  %v322_v13 = vld [vmem:[#allocation5 + $0x48] sm:$0xff]   ;;  %v324_v15 = vld [vmem:[#allocation5 + $0x40] sm:$0xff]  }
  0x22   :  { %v321_v12 = vld [vmem:[#allocation5 + $0x10] sm:$0xff]   ;;  %231 = vmatprep.mubr.bf16.mxu0 %v328_v11  ;;  %v323_v14 = vld [vmem:[#allocation5 + $0x8] sm:$0xff]   ;;  %v325_v16 = vld [vmem:[#allocation5] sm:$0xff]   ;;  %p376_p13 = por %p375_p12, %p374_p11 }
  0x23   :  { %284 = vmatpush3.bf16.msra.mxu0 %v313_v3  ;;  %v326_v17 = vld [vmem:[#allocation2] ss:$8 sps:$4 sm:$0xff]  }
  0x24   :  { %285 = vmatprep.subr.bf16.mxu0 %v314_v4  ;;  %v262_v19 = vld [vmem:[%s442_s2] ss:$0 sm:$0xff]  ;;  %p377_p0 = pnand %p376_p13, %p370_p10 }
  0x27   :  { %286 = vmatpush3.bf16.msra.mxu0 %v315_v5 }
  0x28   :  { %287 = vmatprep.subr.bf16.mxu0 %v316_v6 }
  0x2b   :  { %288 = vmatpush3.bf16.msra.mxu0 %v317_v7 }
  0x2c   :  { %289 = vmatprep.subr.bf16.mxu0 %v318_v8 }
  0x2f   :  { %290 = vmatpush3.bf16.msra.mxu0 %v319_v9 }
  0x30   :  { %291 = vmatprep.subr.bf16.mxu0 %v320_v10 }
  0x33   :  { %292 = vmatpush3.bf16.msra.mxu0 %v321_v12 }
  0x34   :  { %293 = vmatprep.subr.bf16.mxu0 %v322_v13 }
  0x37   :  { %294 = vmatpush3.bf16.msra.mxu0 %v323_v14 }
  0x38   :  { %295 = vmatprep.subr.bf16.mxu0 %v324_v15 }
  0x3b   :  { %296 = vmatpush3.bf16.msra.mxu0 %v325_v16 }
  0x3e   :  { %232 = vmatmul.mubr.bf16.vlgmr.msra.gmra.mxu0 %v326_v17 }
  0xfe   :  { %v297_v18 = vpop.f32.mrf.mxu0 }
 0x100   :  { %v298_v20 = vpop.f32.mrf.mxu0 }
 0x101   :  { %v299_v21 = vadd.f32 %v298_v20, %v297_v18 }
 0x102   :  { %v300_v22 = vpop.f32.mrf.mxu0 }
 0x103   :  { %v240_v23 = vadd.f32 %v299_v21, %v262_v19 }
 0x104   :  { %v301_v24 = vpop.f32.mrf.mxu0 }
 0x105   :  { %242 = vst [vmem:[#allocation7] sm:$0xff] %v240_v23  ;;  %v302_v25 = vadd.f32 %v301_v24, %v300_v22 }
 0x107   :  { %v241_v26 = vadd.f32 %v302_v25, %v262_v19 }
 0x109   :  { %243 = vst [vmem:[#allocation7 + $0x8] sm:$0xff] %v241_v26 }
 0x10a   :  { %380 = shalt.err (!%p377_p0)
}
 0x10b   :  { %255 = dma.vmem_to_hbm [thread:$0]  %s250_s27, 256, %s443_s3, [#allocation4], %s396_s15, %s396_s15, %s397_s16  }
 0x10c   :  { %393 = dma.done.wait [#allocation4], 256  }
 0x10d   :  { %394 = vsyncadd [#allocation4], 4294967040 }
 0x10e   :  { %259 = vsyncpa [#allocation3], 1 }
 0x10f   :  { %260 = vsyncpa [#allocation6], 1 }
 0x110   :  { %261 = vsyncpa [#allocation4], 1 }

</bundles_post_ra>
